<compile_context>
chip_gen: v7x
topology: tpu7x:2x2x1
jax: 0.10.0
libtpu: 0.0.40
codegen_flags: <defaults>
</compile_context>

<pallas_src>
import functools

import jax
import jax.numpy as jnp
from jax.experimental import pallas as pl
from jax.experimental.pallas import tpu as pltpu


def _ce_stable_kernel(logits_ref, labels_ref, out_ref, *, eps, n_rows, tile_n,
                      num_classes):
    # logits_ref: (TILE_N, C) native dtype in VMEM
    # labels_ref: (TILE_N, 1) int32 in VMEM
    # out_ref:    (1, 8, 128) f32 lane-dense partial-sum block
    x = logits_ref[...]                                        # (T, C) native
    labels = labels_ref[...]                                   # (T, 1) int32

    # Row max in native dtype (max is exact in bf16); f32 cast only inside exp.
    m = jnp.max(x, axis=-1, keepdims=True)                     # (T, 1) native

    # Single fused pass over the tile: exp, row-sum, and label gather share e.
    e = jnp.exp(x.astype(jnp.float32) - m.astype(jnp.float32))  # (T, C) f32
    s = jnp.sum(e, axis=-1, keepdims=True)                      # (T, 1)
    col = jax.lax.broadcasted_iota(jnp.int32, (1, num_classes), 1)   # (1, C)
    num = jnp.sum(jnp.where(col == labels, e, 0.0),
                  axis=-1, keepdims=True)                        # (T, 1)

    # softmax(x)[i, y_i] = num / s ; stable CE = -log(p + eps)
    p = num * pl.reciprocal(s, approx=False)                     # (T, 1)
    loss = -jnp.log(p + eps)                                     # (T, 1)

    # Mask rows past the true batch size AFTER the math (the where-select also
    # suppresses any NaN/Inf coming from garbage padded logits in the ragged
    # last block).
    row0 = pl.program_id(0) * tile_n
    rows = row0 + jax.lax.broadcasted_iota(jnp.int32, loss.shape, 0)
    loss = jnp.where(rows < n_rows, loss, 0.0)
    partial = jnp.sum(loss, axis=0, keepdims=True)               # (1, 1)

    # Lane-dense output block: partial sum only at [0, 0, 0], zeros elsewhere,
    # so the wrapper can take one exact jnp.sum over the whole partials array.
    sub = jax.lax.broadcasted_iota(jnp.int32, (8, 128), 0)
    lan = jax.lax.broadcasted_iota(jnp.int32, (8, 128), 1)
    out_ref[...] = jnp.where((sub == 0) & (lan == 0), partial, 0.0)[None]


def cross_entropy_loss_stable(logits, labels, *, eps=1e-8, tile_n=None):
    """Equivalent of CrossEntropyLossStable(reduction='mean', eps=1e-8).forward."""
    n, c = logits.shape
    labels_2d = labels.astype(jnp.int32).reshape(n, 1)
    itemsize = jnp.dtype(logits.dtype).itemsize

    # Generation-aware budgets (v7x has 64 MiB VMEM per TensorCore; v5e/v6e 128 MiB).
    try:
        vmem_cap = int(pltpu.get_tpu_info().vmem_capacity_bytes)
    except Exception:
        vmem_cap = 64 << 20
    if vmem_cap <= (80 << 20):          # v7x-class
        tile_budget = 6 << 20           # bytes per logits tile (native dtype)
        vmem_ceiling = 44 << 20
    else:                               # v5e / v6e
        tile_budget = 14 << 20
        vmem_ceiling = 80 << 20

    if tile_n is None:
        # rows = budget // row_bytes, sublane-aligned; 4096-row cap only bounds
        # the narrow labels / per-row-loss columns.
        tile_n = max(8, min(4096, tile_budget // max(c * itemsize, 1)))
    if n <= tile_n:
        tile_n = n                           # full-extent block is always legal
    else:
        tile_n = max(8, (tile_n // 8) * 8)   # sublane-aligned row tile
    num_blocks = pl.cdiv(n, tile_n)

    # VMEM footprint: 2x double-buffered logits tiles + one (T, C) f32 exp
    # intermediate + margin for labels/output/scalars.
    tile_bytes = tile_n * c * itemsize
    f32_tmp_bytes = tile_n * c * 4
    vmem_limit = int(min(max(2 * tile_bytes + f32_tmp_bytes + (4 << 20), 16 << 20),
                         vmem_ceiling))

    cost = pl.CostEstimate(
        flops=6 * n * c,
        transcendentals=n * c + n,
        bytes_accessed=n * c * itemsize + n * 4 + num_blocks * 8 * 128 * 4,
    )

    partials = pl.pallas_call(
        functools.partial(_ce_stable_kernel, eps=eps, n_rows=n, tile_n=tile_n,
                          num_classes=c),
        out_shape=jax.ShapeDtypeStruct((num_blocks, 8, 128), jnp.float32),
        grid=(num_blocks,),
        in_specs=[
            pl.BlockSpec((tile_n, c), lambda i: (i, 0)),       # logits row tile
            pl.BlockSpec((tile_n, 1), lambda i: (i, 0)),       # labels row tile
        ],
        out_specs=pl.BlockSpec((1, 8, 128), lambda i: (i, 0, 0)),
        compiler_params=pltpu.CompilerParams(
            dimension_semantics=("parallel",),
            vmem_limit_bytes=vmem_limit,
        ),
        cost_estimate=cost,
    )(logits, labels_2d)

    # Exact mean: every block contributed its partial sum at exactly one
    # element (rest zeros), so a single full-array sum is exact; divide by the
    # true N once.
    return jnp.sum(partials) / jnp.float32(n)


def _reference(logits, labels, eps=1e-8):
    # Pure-JAX reference mirroring torch: NLLLoss(log(softmax(x) + eps), y), mean.
    sm = jax.nn.softmax(logits.astype(jnp.float32), axis=-1)
    logp = jnp.log(sm + eps)
    picked = jnp.take_along_axis(logp, labels[:, None].astype(jnp.int32), axis=-1)
    return -jnp.mean(picked)


if __name__ == "__main__":
    key = jax.random.PRNGKey(0)
    k_logits, k_labels = jax.random.split(key)

    N, C = 20, 32  # small demo: 20 samples, 32 classes
    logits = jax.random.normal(k_logits, (N, C), dtype=jnp.float32) * 3.0
    labels = jax.random.randint(k_labels, (N,), 0, C, dtype=jnp.int32)
    ref = _reference(logits, labels)

    # Default tiling (single full-extent block at this small size).
    loss = jax.block_until_ready(cross_entropy_loss_stable(logits, labels))
    assert jnp.allclose(loss, ref, atol=1e-5, rtol=1e-5), (loss, ref)

    # Force a multi-block grid with a ragged last block (tile_n=8 over N=20)
    # to exercise the pipelined/parallel partial-sum path and row masking.
    loss_tiled = jax.block_until_ready(
        cross_entropy_loss_stable(logits, labels, tile_n=8))
    assert jnp.allclose(loss_tiled, ref, atol=1e-5, rtol=1e-5), (loss_tiled, ref)

    # Native bf16 input flows through the BlockSpec; row max / one-hot stay in
    # bf16, exp/sums/log in f32 inside the kernel.
    logits_bf16 = logits.astype(jnp.bfloat16)
    loss_bf16 = jax.block_until_ready(
        cross_entropy_loss_stable(logits_bf16, labels, tile_n=8))
    ref_bf16 = _reference(logits_bf16, labels)
    assert jnp.allclose(loss_bf16, ref_bf16, atol=1e-4, rtol=1e-4), (loss_bf16, ref_bf16)

    print("KERNEL_OK")
</pallas_src>

<mosaic_0001>
module attributes {stable_mosaic.version = 11 : i64} {
  func.func @_ce_stable_kernel(%arg0: i32, %arg1: memref<20x32xf32, #tpu.memory_space<vmem>>, %arg2: memref<20x1xi32, #tpu.memory_space<vmem>>, %arg3: memref<1x8x128xf32, #tpu.memory_space<vmem>>) attributes {dimension_semantics = [#tpu.dimension_semantics<parallel>], iteration_bounds = array<i64: 1>, scalar_prefetch = 0 : i64, scratch_operands = 0 : i64, tpu.core_type = #tpu.core_type<tc>, window_params = [{transform_indices = @transform_0, window_bounds = array<i64: 20, 32>}, {transform_indices = @transform_1, window_bounds = array<i64: 20, 1>}, {transform_indices = @transform_2, window_bounds = array<i64: 1, 8, 128>}]} {
    %c0 = arith.constant 0 : index
    %c0_0 = arith.constant 0 : index
    %0 = vector.load %arg1[%c0, %c0_0] : memref<20x32xf32, #tpu.memory_space<vmem>>, vector<20x32xf32>
    %c0_1 = arith.constant 0 : index
    %c0_2 = arith.constant 0 : index
    %1 = vector.load %arg2[%c0_1, %c0_2] : memref<20x1xi32, #tpu.memory_space<vmem>>, vector<20x1xi32>
    %cst = arith.constant dense<0xFF800000> : vector<20xf32>
    %2 = vector.multi_reduction <maximumf>, %0, %cst [1] : vector<20x32xf32> to vector<20xf32>
    %3 = vector.shape_cast %2 : vector<20xf32> to vector<20x1xf32>
    %4 = vector.broadcast %3 : vector<20x1xf32> to vector<20x32xf32>
    %5 = arith.subf %0, %4 : vector<20x32xf32>
    %6 = math.exp %5 : vector<20x32xf32>
    %cst_3 = arith.constant dense<0.000000e+00> : vector<20xf32>
    %7 = vector.multi_reduction <add>, %6, %cst_3 [1] : vector<20x32xf32> to vector<20xf32>
    %8 = vector.shape_cast %7 : vector<20xf32> to vector<20x1xf32>
    %9 = tpu.iota {dimensions = array<i32: 1>} : vector<1x32xi32>
    %10 = vector.broadcast %9 : vector<1x32xi32> to vector<20x32xi32>
    %11 = vector.broadcast %1 : vector<20x1xi32> to vector<20x32xi32>
    %12 = arith.cmpi eq, %10, %11 : vector<20x32xi32>
    %cst_4 = arith.constant 0.000000e+00 : f32
    %13 = vector.broadcast %cst_4 : f32 to vector<20x32xf32>
    %14 = arith.select %12, %6, %13 : vector<20x32xi1>, vector<20x32xf32>
    %cst_5 = arith.constant dense<0.000000e+00> : vector<20xf32>
    %15 = vector.multi_reduction <add>, %14, %cst_5 [1] : vector<20x32xf32> to vector<20xf32>
    %16 = vector.shape_cast %15 : vector<20xf32> to vector<20x1xf32>
    %17 = tpu.reciprocal %8 : vector<20x1xf32> -> vector<20x1xf32>
    %18 = arith.mulf %16, %17 : vector<20x1xf32>
    %cst_6 = arith.constant 9.99999993E-9 : f32
    %19 = vector.broadcast %cst_6 : f32 to vector<20x1xf32>
    %20 = arith.addf %18, %19 : vector<20x1xf32>
    %21 = math.log %20 : vector<20x1xf32>
    %cst_7 = arith.constant 0.000000e+00 : f32
    %22 = vector.broadcast %cst_7 : f32 to vector<20x1xf32>
    %23 = arith.subf %22, %21 : vector<20x1xf32>
    %c20_i32 = arith.constant 20 : i32
    %24 = arith.muli %arg0, %c20_i32 : i32
    %25 = tpu.iota {dimensions = array<i32: 0>} : vector<20x1xi32>
    %26 = vector.broadcast %24 : i32 to vector<20x1xi32>
    %27 = arith.addi %26, %25 : vector<20x1xi32>
    %c20_i32_8 = arith.constant 20 : i32
    %28 = vector.broadcast %c20_i32_8 : i32 to vector<20x1xi32>
    %29 = arith.cmpi slt, %27, %28 : vector<20x1xi32>
    %cst_9 = arith.constant 0.000000e+00 : f32
    %30 = vector.broadcast %cst_9 : f32 to vector<20x1xf32>
    %31 = arith.select %29, %23, %30 : vector<20x1xi1>, vector<20x1xf32>
    %cst_10 = arith.constant dense<0.000000e+00> : vector<1xf32>
    %32 = vector.multi_reduction <add>, %31, %cst_10 [0] : vector<20x1xf32> to vector<1xf32>
    %33 = vector.shape_cast %32 : vector<1xf32> to vector<1x1xf32>
    %34 = tpu.iota {dimensions = array<i32: 0>} : vector<8x128xi32>
    %35 = tpu.iota {dimensions = array<i32: 1>} : vector<8x128xi32>
    %c0_i32 = arith.constant 0 : i32
    %36 = vector.broadcast %c0_i32 : i32 to vector<8x128xi32>
    %37 = arith.cmpi eq, %34, %36 : vector<8x128xi32>
    %c0_i32_11 = arith.constant 0 : i32
    %38 = vector.broadcast %c0_i32_11 : i32 to vector<8x128xi32>
    %39 = arith.cmpi eq, %35, %38 : vector<8x128xi32>
    %40 = arith.andi %37, %39 : vector<8x128xi1>
    %cst_12 = arith.constant 0.000000e+00 : f32
    %41 = vector.shape_cast %33 : vector<1x1xf32> to vector<1x1xf32>
    %42 = vector.broadcast %41 : vector<1x1xf32> to vector<8x128xf32>
    %43 = vector.broadcast %cst_12 : f32 to vector<8x128xf32>
    %44 = arith.select %40, %42, %43 : vector<8x128xi1>, vector<8x128xf32>
    %45 = vector.shape_cast %44 : vector<8x128xf32> to vector<1x8x128xf32>
    %c0_13 = arith.constant 0 : index
    %c0_14 = arith.constant 0 : index
    %c0_15 = arith.constant 0 : index
    %46 = vector.load %arg3[%c0_13, %c0_14, %c0_15] : memref<1x8x128xf32, #tpu.memory_space<vmem>>, vector<1x8x128xf32>
    tpu.vector_store %arg3[%c0_13, %c0_14, %c0_15], %45 {strides = array<i32>} : memref<1x8x128xf32, #tpu.memory_space<vmem>>, vector<1x8x128xf32>,
    return
  }
  func.func @transform_0(%arg0: i32) -> (i32, i32) {
    %c0_i32 = arith.constant 0 : i32
    %c0_i32_0 = arith.constant 0 : i32
    return %arg0, %c0_i32 : i32, i32
  }
  func.func @transform_1(%arg0: i32) -> (i32, i32) {
    %c0_i32 = arith.constant 0 : i32
    %c0_i32_0 = arith.constant 0 : i32
    return %arg0, %c0_i32 : i32, i32
  }
  func.func @transform_2(%arg0: i32) -> (i32, i32, i32) {
    %c0_i32 = arith.constant 0 : i32
    %c0_i32_0 = arith.constant 0 : i32
    %c0_i32_1 = arith.constant 0 : i32
    return %arg0, %c0_i32, %c0_i32_0 : i32, i32, i32
  }
}

</mosaic_0001>

<bundles_post_ra>
// kernel: tpu_custom_call.1
= control target key start
LH: loop header
LB: loop body
LE: loop exit
PB: predicated region body
PF: predicated region fallthrough
CT: control target
= control target key end

     0   :  { %vm18_vm0 = vcmask 261120   ;;  %vm25_vm1 = vcmask 257024   ;;  %s243_s0 = inlined_call_operand.vmem [shape: f32[20,32], index: 0, kind: input, shape index: {}]   ;;  %s244_s1 = inlined_call_operand.vmem [shape: s32[20,1], index: 1, kind: input, shape index: {}]   ;;  %s245_s2 = inlined_call_operand.hbm [shape: f32[1,8,128], index: 2, kind: output, shape index: {}]  }
   0x1   :  { %v12_v0 = vld [vmem:[%s243_s0] sm:$0xff]  ;;  %v14_v1 = vld [vmem:[%s243_s0 + $0x10] sm:$0xf]  ;;  %v13_v2 = vld [vmem:[%s243_s0 + $0x8] sm:$0xff] }
   0x2   :  { %v19_v3 = vsel %vm18_vm0, %v12_v0, -inf  ;;  %v26_v4 = vsel %vm25_vm1, %v14_v1, -inf }
   0x3   :  { %20 = vmax.xlane.f32.xlu0 %v19_v3  ;;  %27 = vmax.xlane.f32.xlu1 %v26_v4 }
   0x4   :  { %7 = vsyncpa [#allocation3], 0  ;;  %v22_v5 = vsel %vm18_vm0, %v13_v2, -inf  ;;  %v181_v6 = vmov 0   ;;  %v15_v7 = vld [vmem:[%s244_s1] sm:$0xff]  ;;  %v16_v9 = vld [vmem:[%s244_s1 + $0x8] sm:$0xff]  ;;  %v47_v19 = vlaneseq }
   0x5   :  { %137 = vset.pattern.permute.xlu1 %v181_v6  ;;  %138 = vset.pattern.permute.xlu0 %v181_v6  ;;  %v17_v8 = vld [vmem:[%s244_s1 + $0x10] sm:$0xf]  ;;  %vm107_vm6 = vcmask 1043456   ;;  %s182_s1 = smov [#allocation2]  }
   0x6   :  { %v219_v20 = vand.u32 127, %v47_v19  ;;  %v93_v51 = vshrl.u32 %v47_v19, 7  ;;  %s127_s20 = sshll.u32 %s182_s1, 4  ;;  %s128_s20 = int_to_ptr.vmem [resolvable:$true] %s127_s20 }
   0x7   :  { %23 = vmax.xlane.f32.xlu0 %v22_v5  ;;  %s157_s21 = scalar_lea.vmem %s128_s20, 128  ;;  %p162_p1 = scmp.lt.s32.totalorder %s128_s20, %s128_s20 }
   0x8   :  { %v95_v54 = vadd.s32 16, %v93_v51  ;;  %vm116_vm7 = vcmp.eq.s32.totalorder %v93_v51, 0  ;;  %vm117_vm8 = vcmp.eq.s32.totalorder %v219_v20, 0  ;;  %p158_p0 = scmp.ne.s32.totalorder %s128_s20, %s157_s21  ;;  %p163_p2 = scmp.lt.s32.totalorder %s157_s21, %s157_s21 }
   0x9   :  { %vm118_vm9 = vmand %vm116_vm7, %vm117_vm8 }
   0xa   :  { %vm102_vm5 = vcmp.lt.s32.totalorder %v95_v54, 20  ;;  %p164_p3 = por %p163_p2, %p162_p1 }
   0xc   :  { %p165_p4 = pnand %p164_p3, %p158_p0 }
  0x14   :  { %50 = vperm.xlu1 %137, %v15_v7  }
  0x18   :  { %56 = vperm.xlu1 %137, %v17_v8  }
  0x1d   :  { %53 = vperm.xlu0 %138, %v16_v9  }
  0x90   :  { %v21_v10 = vpop.xlane.xlu0 %20  ;;  %v28_v11 = vpop.xlane.xlu1 %27 }
  0x91   :  { %v29_v12 = vsub.f32 %v12_v0, %v21_v10  ;;  %v31_v13 = vsub.f32 %v14_v1, %v28_v11 }
  0x93   :  { %v32_v14 = vmul.f32 1.442695, %v29_v12  ;;  %v36_v15 = vmul.f32 1.442695, %v31_v13 }
  0x94   :  { %v24_v16 = vpop.xlane.xlu0 %23  ;;  %v51_v22 = vpop.permute.xlu1 %50 }
  0x95   :  { %139 = vpow2.f32 %v32_v14  ;;  %v30_v17 = vsub.f32 %v13_v2, %v24_v16  ;;  %vm58_vm2 = vcmp.eq.s32.totalorder %v219_v20, %v51_v22 }
  0x96   :  { %141 = vpow2.f32 %v36_v15 }
  0x97   :  { %v34_v18 = vmul.f32 1.442695, %v30_v17 }
  0x98   :  { %v57_v30 = vpop.permute.xlu1 %56 }
  0x99   :  { %143 = vpow2.f32 %v34_v18  ;;  %vm60_vm4 = vcmp.eq.s32.totalorder %v219_v20, %v57_v30 }
  0x9c   :  { %v54_v27 = vpop.permute.xlu0 %53 }
  0x9d   :  { %vm59_vm3 = vcmp.eq.s32.totalorder %v219_v20, %v54_v27 }
  0x9f   :  { %v140_v21 = vpop.eup %139 }
  0xa0   :  { %v142_v23 = vpop.eup %141  ;;  %v38_v24 = vsel %vm18_vm0, %v140_v21, 0.0  ;;  %v61_v29 = vsel %vm58_vm2, %v140_v21, 0.0 }
  0xa1   :  { %39 = vadd.xlane.f32.xlu1 %v38_v24  ;;  %v44_v25 = vsel %vm25_vm1, %v142_v23, 0.0  ;;  %v64_v31 = vsel %vm18_vm0, %v61_v29, 0.0  ;;  %v63_v34 = vsel %vm60_vm4, %v142_v23, 0.0 }
  0xa2   :  { %v70_v35 = vsel %vm25_vm1, %v63_v34, 0.0 }
  0xa3   :  { %v144_v26 = vpop.eup %143 }
  0xa4   :  { %v41_v28 = vsel %vm18_vm0, %v144_v26, 0.0  ;;  %v62_v32 = vsel %vm59_vm3, %v144_v26, 0.0 }
  0xa5   :  { %45 = vadd.xlane.f32.xlu1 %v44_v25  ;;  %42 = vadd.xlane.f32.xlu0 %v41_v28  ;;  %v67_v33 = vsel %vm18_vm0, %v62_v32, 0.0 }
  0xa9   :  { %65 = vadd.xlane.f32.xlu1 %v64_v31 }
  0xad   :  { %68 = vadd.xlane.f32.xlu1 %v67_v33 }
  0xb1   :  { %71 = vadd.xlane.f32.xlu1 %v70_v35 }
 0x12e   :  { %v40_v36 = vpop.xlane.xlu1 %39 }
 0x12f   :  { %145 = vrcp.f32 %v40_v36 }
 0x132   :  { %v46_v37 = vpop.xlane.xlu1 %45  ;;  %v43_v38 = vpop.xlane.xlu0 %42 }
 0x133   :  { %147 = vrcp.f32 %v46_v37 }
 0x134   :  { %149 = vrcp.f32 %v43_v38 }
 0x136   :  { %v66_v39 = vpop.xlane.xlu1 %65 }
 0x139   :  { %v146_v40 = vpop.eup %145 }
 0x13a   :  { %v76_v41 = vmul.f32 %v146_v40, %v66_v39  ;;  %v69_v42 = vpop.xlane.xlu1 %68 }
 0x13c   :  { %v79_v43 = vadd.f32 1e-08, %v76_v41 }
 0x13d   :  { %v148_v44 = vpop.eup %147 }
 0x13e   :  { %v150_v45 = vpop.eup %149  ;;  %v72_v46 = vpop.xlane.xlu1 %71  ;;  %151 = vlog2.f32 %v79_v43 }
 0x13f   :  { %v77_v47 = vmul.f32 %v150_v45, %v69_v42  ;;  %v78_v48 = vmul.f32 %v148_v44, %v72_v46 }
 0x141   :  { %v80_v49 = vadd.f32 1e-08, %v77_v47  ;;  %v81_v50 = vadd.f32 1e-08, %v78_v48 }
 0x143   :  { %153 = vlog2.f32 %v80_v49 }
 0x144   :  { %155 = vlog2.f32 %v81_v50 }
 0x148   :  { %v152_v52 = vpop.eup %151 }
 0x149   :  { %v83_v53 = vmul.f32 0.6931472, %v152_v52 }
 0x14b   :  { %v88_v59 = vsub.f32 0.0, %v83_v53 }
 0x14d   :  { %v154_v55 = vpop.eup %153 }
 0x14e   :  { %v156_v56 = vpop.eup %155  ;;  %v85_v57 = vmul.f32 0.6931472, %v154_v55 }
 0x14f   :  { %v87_v58 = vmul.f32 0.6931472, %v156_v56 }
 0x150   :  { %v89_v60 = vsub.f32 0.0, %v85_v57 }
 0x151   :  { %v90_v61 = vsub.f32 0.0, %v87_v58 }
 0x152   :  { %v106_v62 = vadd.f32 %v89_v60, %v88_v59 }
 0x153   :  { %v105_v63 = vsel %vm102_vm5, %v90_v61, 0.0 }
 0x154   :  { %v108_v0 = vsel %vm107_vm6, %v105_v63, 0.0 }
 0x155   :  { %v109_v1 = vadd.f32 %v108_v0, %v106_v62 }
 0x157   :  { %v110_v2 = vrot.slane %v109_v1, 4 }
 0x159   :  { %v111_v3 = vadd.f32 %v110_v2, %v109_v1 }
 0x15b   :  { %v112_v4 = vrot.slane %v111_v3, 2 }
 0x15d   :  { %v113_v5 = vadd.f32 %v112_v4, %v111_v3 }
 0x15f   :  { %v114_v6 = vrot.slane %v113_v5, 1 }
 0x161   :  { %v115_v7 = vadd.f32 %v114_v6, %v113_v5 }
 0x163   :  { %v119_v8 = vsel %vm118_vm9, %v115_v7, 0.0 }
 0x164   :  { %120 = vst [vmem:[#allocation2] sm:$0xff] %v119_v8 }
 0x165   :  { %168 = shalt.err (!%p165_p4)
}
 0x166   :  { %s169_s24 = scalar_lea.hbm %s245_s2, 128 }
 0x167   :  { %p170_p5 = scmp.ne.s32.totalorder %s245_s2, %s169_s24  ;;  %p173_p6 = scmp.lt.u32.totalorder %s169_s24, %s245_s2 }
 0x169   :  { %p175_p7 = pnand %p173_p6, %p170_p5 }
 0x16b   :  { %178 = shalt.err (!%p175_p7)
}
 0x16c   :  { %130 = dma.vmem_to_hbm [thread:$0]  %s128_s20, 128, %s245_s2, [#allocation3]  }
 0x16d   :  { %179 = dma.done.wait [#allocation3], 128  }
 0x16e   :  { %180 = vsyncadd [#allocation3], 4294967168 }
 0x16f   :  { %134 = vsyncpa [#allocation3], 1 }

</bundles_post_ra>
